<compile_context>
chip_gen: v7x
topology: tpu7x:2x2x1
jax: 0.10.0
libtpu: 0.0.40
codegen_flags: <defaults>
</compile_context>

<pallas_src>
import jax
import jax.numpy as jnp
from jax.experimental import pallas as pl
from jax.experimental.pallas import tpu as pltpu


def _loss_branch_kernel(x_ref,
                        w1_ref, b1_ref,
                        w2_ref, b2_ref,
                        w3s_ref, b3s_ref,
                        w3b_ref, b3b_ref,
                        score_ref, box_ref):
    # x: (C, TP) f32.  Weights/biases f32.  Outputs f32.
    x = x_ref[...]
    C = w1_ref.shape[0]

    # conv1 (1x1) + ReLU  -> shared trunk, (C, TP)
    h1 = jnp.dot(w1_ref[...], x, preferred_element_type=jnp.float32) + b1_ref[...]
    h1 = jnp.maximum(h1, 0.0)

    # fused conv2_score|conv2_box + ReLU, (2C, TP)
    h2 = jnp.dot(w2_ref[...], h1, preferred_element_type=jnp.float32) + b2_ref[...]
    h2 = jnp.maximum(h2, 0.0)

    # conv3 heads (no activation), written straight to the two outputs.
    # Split at row C: C is a multiple of 8, so this is sublane-aligned (cheap).
    score_ref[...] = (jnp.dot(w3s_ref[...], h2[:C],
                              preferred_element_type=jnp.float32) + b3s_ref[...])
    box_ref[...] = (jnp.dot(w3b_ref[...], h2[C:],
                            preferred_element_type=jnp.float32) + b3b_ref[...])


def loss_branch_forward(x_nchw, params, *, tile_p=1024):
    """x_nchw: (N, C, H, W) float32. Returns (score, box) in NCHW, float32."""
    N, C, H, W = x_nchw.shape
    num_classes = params["w3s"].shape[0]
    HW = H * W

    # (N, C, H, W) -> (N, C, H*W): contiguous reshape, no data movement.
    x_flat = x_nchw.reshape(N, C, HW)

    # Lane tile: multiple of 128, capped by the (128-padded) pixel count.
    hw_pad128 = ((HW + 127) // 128) * 128
    tile_p = ((tile_p // 128) * 128) or 128
    tile_p = max(128, min(tile_p, hw_pad128))
    n_tiles = pl.cdiv(hw_pad128, tile_p)
    HW_pad = n_tiles * tile_p
    if HW_pad != HW:
        x_flat = jnp.pad(x_flat, ((0, 0), (0, 0), (0, HW_pad - HW)))

    # Fuse the two conv2 branches into a single (2C, C) matmul.
    w1, b1 = params["w1"], params["b1"]                              # (C,C) (C,1)
    w2f = jnp.concatenate([params["w2s"], params["w2b"]], axis=0)    # (2C, C)
    b2f = jnp.concatenate([params["b2s"], params["b2b"]], axis=0)    # (2C, 1)
    w3s, b3s = params["w3s"], params["b3s"]                          # (ncls,C)
    w3b, b3b = params["w3b"], params["b3b"]                          # (4,C)

    def whole(arr):
        return pl.BlockSpec(arr.shape, lambda n, i: (0,) * arr.ndim)

    score_flat, box_flat = pl.pallas_call(
        _loss_branch_kernel,
        out_shape=(
            jax.ShapeDtypeStruct((N, num_classes, HW_pad), jnp.float32),
            jax.ShapeDtypeStruct((N, 4, HW_pad), jnp.float32),
        ),
        grid_spec=pltpu.PrefetchScalarGridSpec(
            num_scalar_prefetch=0,
            grid=(N, n_tiles),
            in_specs=[
                pl.BlockSpec((None, C, tile_p), lambda n, i: (n, 0, i)),  # x tile
                whole(w1), whole(b1),
                whole(w2f), whole(b2f),
                whole(w3s), whole(b3s),
                whole(w3b), whole(b3b),
            ],
            out_specs=(
                pl.BlockSpec((None, num_classes, tile_p), lambda n, i: (n, 0, i)),
                pl.BlockSpec((None, 4, tile_p), lambda n, i: (n, 0, i)),
            ),
        ),
        compiler_params=pltpu.CompilerParams(
            dimension_semantics=("parallel", "parallel")),
    )(x_flat, w1, b1, w2f, b2f, w3s, b3s, w3b, b3b)

    # Drop lane padding (no-op when HW is already a multiple of tile_p) and
    # reshape back to NCHW - both free / near-free, no transposes needed.
    score = score_flat[:, :, :HW].reshape(N, num_classes, H, W)
    box = box_flat[:, :, :HW].reshape(N, 4, H, W)
    return score, box


def init_params(key, planes, num_classes=2):
    """Deterministic synthetic params. 1x1 conv weight (out,in,1,1) is stored
    as (out, in) for channel-major left-multiplication; bias as (out, 1)."""
    ks = jax.random.split(key, 10)
    scale = 0.1

    def w(k, cout, cin):
        return scale * jax.random.normal(k, (cout, cin), dtype=jnp.float32)

    def b(k, cout):
        return scale * jax.random.normal(k, (cout, 1), dtype=jnp.float32)

    return {
        "w1": w(ks[0], planes, planes),        "b1": b(ks[1], planes),
        "w2s": w(ks[2], planes, planes),       "b2s": b(ks[3], planes),
        "w3s": w(ks[4], num_classes, planes),  "b3s": b(ks[5], num_classes),
        "w2b": w(ks[6], planes, planes),       "b2b": b(ks[7], planes),
        "w3b": w(ks[8], 4, planes),            "b3b": b(ks[9], 4),
    }


def _reference(x_nchw, p):
    """Pure-JAX f32 reference replicating the PyTorch forward."""
    N, C, H, W = x_nchw.shape
    xf = jnp.transpose(x_nchw, (0, 2, 3, 1)).reshape(-1, C)          # (P, C)
    out = jax.nn.relu(xf @ p["w1"].T + p["b1"].T)
    s = jax.nn.relu(out @ p["w2s"].T + p["b2s"].T) @ p["w3s"].T + p["b3s"].T
    b = jax.nn.relu(out @ p["w2b"].T + p["b2b"].T) @ p["w3b"].T + p["b3b"].T
    score = jnp.transpose(s.reshape(N, H, W, -1), (0, 3, 1, 2))
    box = jnp.transpose(b.reshape(N, H, W, -1), (0, 3, 1, 2))
    return score, box


if __name__ == "__main__":
    key = jax.random.PRNGKey(0)
    k_x, k_p = jax.random.split(key)

    N, planes, H, W = 2, 32, 16, 16     # H*W = 256 pixels -> one 256-wide tile/batch
    num_classes = 2

    x = jax.random.normal(k_x, (N, planes, H, W), dtype=jnp.float32)
    params = init_params(k_p, planes, num_classes)

    score, box = loss_branch_forward(x, params)
    score, box = jax.block_until_ready((score, box))

    # sanity check against pure-JAX f32 reference (tolerance covers the TPU
    # MXU's internal matmul precision for f32 operands).
    score_ref, box_ref = _reference(x, params)
    assert score.shape == (N, num_classes, H, W)
    assert box.shape == (N, 4, H, W)
    assert jnp.allclose(score, score_ref, atol=2e-2, rtol=2e-2)
    assert jnp.allclose(box, box_ref, atol=2e-2, rtol=2e-2)

    print("KERNEL_OK")
</pallas_src>

<mosaic_0001>
module attributes {stable_mosaic.version = 11 : i64} {
  func.func @_loss_branch_kernel(%arg0: i32, %arg1: i32, %arg2: memref<1x32x256xf32, #tpu.memory_space<vmem>>, %arg3: memref<32x32xf32, #tpu.memory_space<vmem>>, %arg4: memref<32x1xf32, #tpu.memory_space<vmem>>, %arg5: memref<64x32xf32, #tpu.memory_space<vmem>>, %arg6: memref<64x1xf32, #tpu.memory_space<vmem>>, %arg7: memref<2x32xf32, #tpu.memory_space<vmem>>, %arg8: memref<2x1xf32, #tpu.memory_space<vmem>>, %arg9: memref<4x32xf32, #tpu.memory_space<vmem>>, %arg10: memref<4x1xf32, #tpu.memory_space<vmem>>, %arg11: memref<1x2x256xf32, #tpu.memory_space<vmem>>, %arg12: memref<1x4x256xf32, #tpu.memory_space<vmem>>) attributes {dimension_semantics = [#tpu.dimension_semantics<parallel>, #tpu.dimension_semantics<parallel>], iteration_bounds = array<i64: 2, 1>, scalar_prefetch = 0 : i64, scratch_operands = 0 : i64, tpu.core_type = #tpu.core_type<tc>, window_params = [{transform_indices = @transform_0, window_bounds = array<i64: 1, 32, 256>}, {pipeline_mode = #tpu.pipeline_mode<synchronous>, transform_indices = @transform_1, window_bounds = array<i64: 32, 32>}, {pipeline_mode = #tpu.pipeline_mode<synchronous>, transform_indices = @transform_2, window_bounds = array<i64: 32, 1>}, {pipeline_mode = #tpu.pipeline_mode<synchronous>, transform_indices = @transform_3, window_bounds = array<i64: 64, 32>}, {pipeline_mode = #tpu.pipeline_mode<synchronous>, transform_indices = @transform_4, window_bounds = array<i64: 64, 1>}, {pipeline_mode = #tpu.pipeline_mode<synchronous>, transform_indices = @transform_5, window_bounds = array<i64: 2, 32>}, {pipeline_mode = #tpu.pipeline_mode<synchronous>, transform_indices = @transform_6, window_bounds = array<i64: 2, 1>}, {pipeline_mode = #tpu.pipeline_mode<synchronous>, transform_indices = @transform_7, window_bounds = array<i64: 4, 32>}, {pipeline_mode = #tpu.pipeline_mode<synchronous>, transform_indices = @transform_8, window_bounds = array<i64: 4, 1>}, {transform_indices = @transform_9, window_bounds = array<i64: 1, 2, 256>}, {transform_indices = @transform_10, window_bounds = array<i64: 1, 4, 256>}]} {
    %c0 = arith.constant 0 : index
    %c0_0 = arith.constant 0 : index
    %c0_1 = arith.constant 0 : index
    %0 = vector.load %arg2[%c0, %c0_0, %c0_1] : memref<1x32x256xf32, #tpu.memory_space<vmem>>, vector<1x32x256xf32>
    %1 = vector.shape_cast %0 : vector<1x32x256xf32> to vector<32x256xf32>
    %c0_2 = arith.constant 0 : index
    %c0_3 = arith.constant 0 : index
    %2 = vector.load %arg3[%c0_2, %c0_3] : memref<32x32xf32, #tpu.memory_space<vmem>>, vector<32x32xf32>
    %cst = arith.constant dense<0.000000e+00> : vector<32x256xf32>
    %3 = tpu.matmul %2, %1, %cst {dimension_numbers = #tpu.dot_dimension_numbers<[1], [0], [0], [1], [0, 0, 1, 1], [], []>} : vector<32x32xf32>, vector<32x256xf32>, vector<32x256xf32> -> vector<32x256xf32>
    %c0_4 = arith.constant 0 : index
    %c0_5 = arith.constant 0 : index
    %4 = vector.load %arg4[%c0_4, %c0_5] : memref<32x1xf32, #tpu.memory_space<vmem>>, vector<32x1xf32>
    %5 = vector.broadcast %4 : vector<32x1xf32> to vector<32x256xf32>
    %6 = arith.addf %3, %5 : vector<32x256xf32>
    %cst_6 = arith.constant 0.000000e+00 : f32
    %7 = vector.broadcast %cst_6 : f32 to vector<32x256xf32>
    %8 = arith.maximumf %6, %7 : vector<32x256xf32>
    %c0_7 = arith.constant 0 : index
    %c0_8 = arith.constant 0 : index
    %9 = vector.load %arg5[%c0_7, %c0_8] : memref<64x32xf32, #tpu.memory_space<vmem>>, vector<64x32xf32>
    %cst_9 = arith.constant dense<0.000000e+00> : vector<64x256xf32>
    %10 = tpu.matmul %9, %8, %cst_9 {dimension_numbers = #tpu.dot_dimension_numbers<[1], [0], [0], [1], [0, 0, 1, 1], [], []>} : vector<64x32xf32>, vector<32x256xf32>, vector<64x256xf32> -> vector<64x256xf32>
    %c0_10 = arith.constant 0 : index
    %c0_11 = arith.constant 0 : index
    %11 = vector.load %arg6[%c0_10, %c0_11] : memref<64x1xf32, #tpu.memory_space<vmem>>, vector<64x1xf32>
    %12 = vector.broadcast %11 : vector<64x1xf32> to vector<64x256xf32>
    %13 = arith.addf %10, %12 : vector<64x256xf32>
    %cst_12 = arith.constant 0.000000e+00 : f32
    %14 = vector.broadcast %cst_12 : f32 to vector<64x256xf32>
    %15 = arith.maximumf %13, %14 : vector<64x256xf32>
    %c0_13 = arith.constant 0 : index
    %c0_14 = arith.constant 0 : index
    %16 = vector.load %arg7[%c0_13, %c0_14] : memref<2x32xf32, #tpu.memory_space<vmem>>, vector<2x32xf32>
    %17 = vector.extract_strided_slice %15 {offsets = [0, 0], sizes = [32, 256], strides = [1, 1]} : vector<64x256xf32> to vector<32x256xf32>
    %cst_15 = arith.constant dense<0.000000e+00> : vector<2x256xf32>
    %18 = tpu.matmul %16, %17, %cst_15 {dimension_numbers = #tpu.dot_dimension_numbers<[1], [0], [0], [1], [0, 0, 1, 1], [], []>} : vector<2x32xf32>, vector<32x256xf32>, vector<2x256xf32> -> vector<2x256xf32>
    %c0_16 = arith.constant 0 : index
    %c0_17 = arith.constant 0 : index
    %19 = vector.load %arg8[%c0_16, %c0_17] : memref<2x1xf32, #tpu.memory_space<vmem>>, vector<2x1xf32>
    %20 = vector.broadcast %19 : vector<2x1xf32> to vector<2x256xf32>
    %21 = arith.addf %18, %20 : vector<2x256xf32>
    %c0_18 = arith.constant 0 : index
    %c0_19 = arith.constant 0 : index
    %c0_20 = arith.constant 0 : index
    %22 = vector.load %arg11[%c0_18, %c0_19, %c0_20] : memref<1x2x256xf32, #tpu.memory_space<vmem>>, vector<1x2x256xf32>
    %23 = vector.shape_cast %22 : vector<1x2x256xf32> to vector<2x256xf32>
    %24 = vector.shape_cast %21 : vector<2x256xf32> to vector<1x2x256xf32>
    tpu.vector_store %arg11[%c0_18, %c0_19, %c0_20], %24 {strides = array<i32>} : memref<1x2x256xf32, #tpu.memory_space<vmem>>, vector<1x2x256xf32>,
    %c0_21 = arith.constant 0 : index
    %c0_22 = arith.constant 0 : index
    %25 = vector.load %arg9[%c0_21, %c0_22] : memref<4x32xf32, #tpu.memory_space<vmem>>, vector<4x32xf32>
    %26 = vector.extract_strided_slice %15 {offsets = [32, 0], sizes = [32, 256], strides = [1, 1]} : vector<64x256xf32> to vector<32x256xf32>
    %cst_23 = arith.constant dense<0.000000e+00> : vector<4x256xf32>
    %27 = tpu.matmul %25, %26, %cst_23 {dimension_numbers = #tpu.dot_dimension_numbers<[1], [0], [0], [1], [0, 0, 1, 1], [], []>} : vector<4x32xf32>, vector<32x256xf32>, vector<4x256xf32> -> vector<4x256xf32>
    %c0_24 = arith.constant 0 : index
    %c0_25 = arith.constant 0 : index
    %28 = vector.load %arg10[%c0_24, %c0_25] : memref<4x1xf32, #tpu.memory_space<vmem>>, vector<4x1xf32>
    %29 = vector.broadcast %28 : vector<4x1xf32> to vector<4x256xf32>
    %30 = arith.addf %27, %29 : vector<4x256xf32>
    %c0_26 = arith.constant 0 : index
    %c0_27 = arith.constant 0 : index
    %c0_28 = arith.constant 0 : index
    %31 = vector.load %arg12[%c0_26, %c0_27, %c0_28] : memref<1x4x256xf32, #tpu.memory_space<vmem>>, vector<1x4x256xf32>
    %32 = vector.shape_cast %31 : vector<1x4x256xf32> to vector<4x256xf32>
    %33 = vector.shape_cast %30 : vector<4x256xf32> to vector<1x4x256xf32>
    tpu.vector_store %arg12[%c0_26, %c0_27, %c0_28], %33 {strides = array<i32>} : memref<1x4x256xf32, #tpu.memory_space<vmem>>, vector<1x4x256xf32>,
    return
  }
  func.func @transform_0(%arg0: i32, %arg1: i32) -> (i32, i32, i32) {
    %c0_i32 = arith.constant 0 : i32
    %c0_i32_0 = arith.constant 0 : i32
    return %arg0, %c0_i32, %arg1 : i32, i32, i32
  }
  func.func @transform_1(%arg0: i32, %arg1: i32) -> (i32, i32) {
    %c0_i32 = arith.constant 0 : i32
    %c0_i32_0 = arith.constant 0 : i32
    %c0_i32_1 = arith.constant 0 : i32
    return %c0_i32, %c0_i32_0 : i32, i32
  }
  func.func @transform_2(%arg0: i32, %arg1: i32) -> (i32, i32) {
    %c0_i32 = arith.constant 0 : i32
    %c0_i32_0 = arith.constant 0 : i32
    %c0_i32_1 = arith.constant 0 : i32
    return %c0_i32, %c0_i32_0 : i32, i32
  }
  func.func @transform_3(%arg0: i32, %arg1: i32) -> (i32, i32) {
    %c0_i32 = arith.constant 0 : i32
    %c0_i32_0 = arith.constant 0 : i32
    %c0_i32_1 = arith.constant 0 : i32
    return %c0_i32, %c0_i32_0 : i32, i32
  }
  func.func @transform_4(%arg0: i32, %arg1: i32) -> (i32, i32) {
    %c0_i32 = arith.constant 0 : i32
    %c0_i32_0 = arith.constant 0 : i32
    %c0_i32_1 = arith.constant 0 : i32
    return %c0_i32, %c0_i32_0 : i32, i32
  }
  func.func @transform_5(%arg0: i32, %arg1: i32) -> (i32, i32) {
    %c0_i32 = arith.constant 0 : i32
    %c0_i32_0 = arith.constant 0 : i32
    %c0_i32_1 = arith.constant 0 : i32
    return %c0_i32, %c0_i32_0 : i32, i32
  }
  func.func @transform_6(%arg0: i32, %arg1: i32) -> (i32, i32) {
    %c0_i32 = arith.constant 0 : i32
    %c0_i32_0 = arith.constant 0 : i32
    %c0_i32_1 = arith.constant 0 : i32
    return %c0_i32, %c0_i32_0 : i32, i32
  }
  func.func @transform_7(%arg0: i32, %arg1: i32) -> (i32, i32) {
    %c0_i32 = arith.constant 0 : i32
    %c0_i32_0 = arith.constant 0 : i32
    %c0_i32_1 = arith.constant 0 : i32
    return %c0_i32, %c0_i32_0 : i32, i32
  }
  func.func @transform_8(%arg0: i32, %arg1: i32) -> (i32, i32) {
    %c0_i32 = arith.constant 0 : i32
    %c0_i32_0 = arith.constant 0 : i32
    %c0_i32_1 = arith.constant 0 : i32
    return %c0_i32, %c0_i32_0 : i32, i32
  }
  func.func @transform_9(%arg0: i32, %arg1: i32) -> (i32, i32, i32) {
    %c0_i32 = arith.constant 0 : i32
    %c0_i32_0 = arith.constant 0 : i32
    return %arg0, %c0_i32, %arg1 : i32, i32, i32
  }
  func.func @transform_10(%arg0: i32, %arg1: i32) -> (i32, i32, i32) {
    %c0_i32 = arith.constant 0 : i32
    %c0_i32_0 = arith.constant 0 : i32
    return %arg0, %c0_i32, %arg1 : i32, i32, i32
  }
}

</mosaic_0001>

<bundles_post_ra>
// kernel: tpu_custom_call.1
= control target key start
LH: loop header
LB: loop body
LE: loop exit
PB: predicated region body
PF: predicated region fallthrough
CT: control target
= control target key end

     0   :  { %s1647_s0 = inlined_call_operand.vmem [shape: f32[2,32,256], index: 0, kind: input, shape index: {}]   ;;  %s1648_s1 = inlined_call_operand.vmem [shape: f32[32,32], index: 1, kind: input, shape index: {}]   ;;  %s1649_s2 = inlined_call_operand.vmem [shape: f32[32,1], index: 2, kind: input, shape index: {}]   ;;  %s1650_s3 = inlined_call_operand.vmem [shape: f32[64,32], index: 3, kind: input, shape index: {}]   ;;  %s1651_s4 = inlined_call_operand.vmem [shape: f32[64,1], index: 4, kind: input, shape index: {}]   ;;  %s1652_s5 = inlined_call_operand.vmem [shape: f32[2,32], index: 5, kind: input, shape index: {}]   ;;  %s1653_s6 = inlined_call_operand.vmem [shape: f32[2,1], index: 6, kind: input, shape index: {}]   ;;  %s1654_s7 = inlined_call_operand.vmem [shape: f32[4,32], index: 7, kind: input, shape index: {}]   ;;  %s1655_s8 = inlined_call_operand.vmem [shape: f32[4,1], index: 8, kind: input, shape index: {}]   ;;  %s1656_s9 = inlined_call_operand.hbm [shape: f32[2,2,256], index: 9, kind: output, shape index: {0}]   ;;  %s1657_s10 = inlined_call_operand.hbm [shape: f32[2,4,256], index: 10, kind: output, shape index: {1}]  }
   0x1   :  { %1658 = sst [smem:[#allocation8_spill]] %s1647_s0 }
   0x2   :  { %1659 = sst [smem:[#allocation9_spill]] %s1648_s1 }
   0x3   :  { %16 = vsyncpa [#allocation3], 0 }
   0x4   :  { %18 = vsyncpa [#allocation3 + $0x1], 0 }
   0x5   :  { %19 = vsyncpa [#allocation5], 0 }
   0x6   :  { %21 = vsyncpa [#allocation5 + $0x1], 0  ;;  %s1388_s13 = smov 0   ;;  %s1390_s14 = smov 0  }
   0x7   :  { %s1392_s15 = smov 0   ;;  %s1394_s16 = smov 0  }
   0x8   :  { %s1396_s17 = smov 0   ;;  %s1398_s18 = smov 0  }
   0x9 LB: > { %s1086_s19 = sadd.s32 4294967295, %s1327_s18   ;;  %s1087_s20 = sadd.s32 4294967294, %s1327_s18   ;;  %s1327_s18 = sphi %s1398_s18, %s27_s18   ;;  %s1323_s17 = sphi %s1396_s17, %s1668_s17   ;;  %s1319_s16 = sphi %s1394_s16, %s1667_s16   ;;  %s1315_s15 = sphi %s1392_s15, %s1666_s15   ;;  %s1311_s14 = sphi %s1390_s14, %s1665_s14   ;;  %s1307_s13 = sphi %s1388_s13, %s1664_s13  }
   0xa   : > { %s39_s21 = sadd.s32 1, %s1323_s17  ;;  %s244_s22 = sadd.s32 1, %s1315_s15 }
   0xb   : > { %p41_p0 = scmp.ge.s32.totalorder %s39_s21, 2  ;;  %p254_p1 = scmp.ne.s32.totalorder %s1315_s15, %s1311_s14 }
   0xc   : > { %p255_p2 = scmp.eq.s32.totalorder %s1086_s19, 1  ;;  %p260_p3 = scmp.ne.s32.totalorder %s1311_s14, %s1307_s13 }
   0xd   : > { %s1670_s21 = smov (%p41_p0, %s39_s21), 0  ;;  %p261_p5 = scmp.eq.s32.totalorder %s1087_s20, 1 }
   0xe   : > { %p1428_p4 = por %p255_p2, %p254_p1  ;;  %s239_s24 = ssub.s32 %s1323_s17, %s1670_s21 }
   0xf   : > { %p1090_p6 = scmp.ge.s32.totalorder %s1327_s18, 1  ;;  %p242_p7 = scmp.eq.s32.totalorder %s239_s24, 0 }
  0x10   : > { %p1435_p8 = por %p261_p5, %p260_p3  ;;  %p344_p9 = scmp.lt.s32.totalorder %s1327_s18, 3 }
  0x11   : > { %s1441_s26 = scalar_select %p242_p7, %s1315_s15, %s244_s22  }
  0x12   : > { %p345_p10 = pnand %p1090_p6, %p344_p9 }
  0x13   : > { %p392_p11 = scmp.lt.s32.totalorder (!%p345_p10), %s1319_s16, 1  ;;  %v1329_v0 = vmov (!%p345_p10), 0.0   ;;  %v415_v1 = vld [vmem:[%s1649_s2] sm:$0xff] (!%p345_p10)  ;;  %v417_v2 = vld [vmem:[%s1649_s2 + $0x10] sm:$0xff] (!%p345_p10)  ;;  %v1330_v3 = vmov (!%p345_p10), 0   ;;  %v416_v4 = vld [vmem:[%s1649_s2 + $0x8] sm:$0xff] (!%p345_p10) }
  0x14   : > { %348 = sbr.rel (%p345_p10) target bundleno = 768 (0x300), region = 56  ;;  %516 = vmatprep.mubr.f32.mxu0 (!%p345_p10), %v1329_v0  ;;  %693 = vmatprep.mubr.f32.mxu1 (!%p345_p10), %v1329_v0  ;;  %v418_v5 = vld [vmem:[%s1649_s2 + $0x18] sm:$0xff] (!%p345_p10)  ;;  %s1662_s0 = sld [smem:[#allocation8_spill]] (!%p345_p10)  ;;  %v557_v17 = vld [vmem:[%s1651_s4] sm:$0xff] (!%p345_p10)  ;;  %v558_v18 = vld [vmem:[%s1651_s4 + $0x8] sm:$0xff] (!%p345_p10)  ;;  %vm439_vm0 = vcmask (!%p345_p10), 261120  }
  0x15   : > { %1215 = vset.pattern.permute.xlu0 (!%p345_p10), %v1330_v3  ;;  %1216 = vset.pattern.permute.xlu1 (!%p345_p10), %v1330_v3  ;;  %v559_v20 = vld [vmem:[%s1651_s4 + $0x10] sm:$0xff] (!%p345_p10)  ;;  %v560_v21 = vld [vmem:[%s1651_s4 + $0x18] sm:$0xff] (!%p345_p10)  ;;  %s1663_s1 = sld [smem:[#allocation9_spill]] (!%p345_p10)  ;;  %v561_v23 = vld [vmem:[%s1651_s4 + $0x20] sm:$0xff] (!%p345_p10)  ;;  %s1561_s28 = sand.u32 (!%p345_p10), 1, %s1311_s14  }
  0x16   : > { %421 = vperm.xlu0 (!%p345_p10), %1215, %v415_v1   ;;  %431 = vperm.xlu1 (!%p345_p10), %1216, %v417_v2   ;;  %v562_v24 = vld [vmem:[%s1651_s4 + $0x28] sm:$0xff] (!%p345_p10)  ;;  %v563_v26 = vld [vmem:[%s1651_s4 + $0x30] sm:$0xff] (!%p345_p10)  ;;  %v564_v27 = vld [vmem:[%s1651_s4 + $0x38] sm:$0xff] (!%p345_p10)  ;;  %s1119_s30 = sshll.u32 (!%p345_p10), %s1319_s16, 6  ;;  %s938_s24 = scalar_lea.sflag (!%p345_p10), [#allocation3], %s1561_s28 }
  0x17   : > { %v759_v29 = vld [vmem:[%s1653_s6] sm:$0x3] (!%p345_p10)  ;;  %v550_v2 = vld [vmem:[%s1650_s3 + $0x8] sm:$0xff] (!%p345_p10)  ;;  %v551_v3 = vld [vmem:[%s1650_s3 + $0x10] sm:$0xff] (!%p345_p10)  ;;  %s1568_s22 = scalar_lea.hbm (!%p345_p10), %s1656_s9, %s1119_s30 }
  0x18   : > { %v852_v30 = vld [vmem:[%s1655_s8] sm:$0xf] (!%p345_p10) }
  0x19   : > { %v549_v1 = vld [vmem:[%s1650_s3] sm:$0xff] (!%p345_p10) }
  0x1a   : > { %426 = vperm.xlu0 (!%p345_p10), %1215, %v416_v4   ;;  %436 = vperm.xlu1 (!%p345_p10), %1216, %v418_v5   ;;  %v552_v4 = vld [vmem:[%s1650_s3 + $0x18] sm:$0xff] (!%p345_p10)  ;;  %v553_v5 = vld [vmem:[%s1650_s3 + $0x20] sm:$0xff] (!%p345_p10) }
  0x1b   : > { %s393_s11 = scalar_select %p392_p11, %s1319_s16, 1  ;;  %v411_v22 = vld [vmem:[%s1663_s1] sm:$0xff]  ;;  %v412_v25 = vld [vmem:[%s1663_s1 + $0x8] sm:$0xff]  ;;  %v413_v28 = vld [vmem:[%s1663_s1 + $0x10] sm:$0xff] }
  0x1c   : > { %v414_v31 = vld [vmem:[%s1663_s1 + $0x18] sm:$0xff] }
  0x1d   : > { %s1118_s12 = sshll.u32 %s393_s11, 6 }
  0x1e   : > { %s399_s29 = scalar_lea.vmem %s1662_s0, %s1118_s12  ;;  %567 = vperm.xlu0 %1215, %v557_v17   ;;  %572 = vperm.xlu1 %1216, %v558_v18  }
  0x1f   : > { %v404_v6 = vld [vmem:[%s399_s29 + $0x8] sm:$0xff]  ;;  %v406_v7 = vld [vmem:[%s399_s29 + $0x18] sm:$0xff]  ;;  %v403_v8 = vld [vmem:[%s399_s29] sm:$0xff] }
  0x20   : > { %v1121_v9 = vpack.c.bf16 %v406_v7, %v404_v6  ;;  %v405_v10 = vld [vmem:[%s399_s29 + $0x10] sm:$0xff]  ;;  %v408_v11 = vld [vmem:[%s399_s29 + $0x28] sm:$0xff]  ;;  %v410_v12 = vld [vmem:[%s399_s29 + $0x38] sm:$0xff] }
  0x21   : > { %v1123_v13 = vpack.c.bf16 %v405_v10, %v403_v8  ;;  %v1125_v14 = vpack.c.bf16 %v410_v12, %v408_v11  ;;  %v407_v15 = vld [vmem:[%s399_s29 + $0x20] sm:$0xff]  ;;  %v409_v16 = vld [vmem:[%s399_s29 + $0x30] sm:$0xff]  ;;  %v554_v6 = vld [vmem:[%s1650_s3 + $0x28] sm:$0xff]  ;;  %s1091_s29 = sshll.u32 %s1561_s28, 2 }
  0x22   : > { %1122 = vmatprep.subr.bf16.mxu0 %v1121_v9  ;;  %v1127_v19 = vpack.c.bf16 %v409_v16, %v407_v15  ;;  %577 = vperm.xlu0 %1215, %v559_v20   ;;  %v555_v7 = vld [vmem:[%s1650_s3 + $0x30] sm:$0xff]  ;;  %v556_v8 = vld [vmem:[%s1650_s3 + $0x38] sm:$0xff]  ;;  %s383_s11 = scalar_lea.vmem [#allocation2], %s1091_s29  ;;  %s1331_s29 = smov [#allocation2]  }
  0x23   : > { %1124 = vmatpush1.bf16.msra.mxu0 %v1123_v13  ;;  %582 = vperm.xlu1 %1216, %v560_v21   ;;  %s959_s19 = sshll.u32 %s383_s11, 4  ;;  %s1221_s0 = sshll.u32 %s1331_s29, 4  ;;  %s1570_s19 = int_to_ptr.vmem [resolvable:$true] %s959_s19  ;;  %s1222_s0 = int_to_ptr.vmem [resolvable:$false] %s1221_s0 }
  0x24   : > { %1126 = vmatprep.subr.bf16.mxu0 %v1125_v14  ;;  %s1217_s27 = scalar_lea.vmem %s1570_s19, 64  ;;  %s1223_s1 = scalar_lea.vmem %s1222_s0, 128 }
  0x25   : > { %p1218_p12 = scmp.ne.s32.totalorder %s1570_s19, %s1217_s27  ;;  %p1224_p1 = scmp.lt.s32.totalorder %s1570_s19, %s1222_s0 }
  0x26   : > { %587 = vperm.xlu0 %1215, %v561_v23   ;;  %p1225_p2 = scmp.lt.s32.totalorder %s1223_s1, %s1217_s27 }
  0x27   : > { %1128 = vmatpush1.bf16.msra.mxu0 %v1127_v19  ;;  %592 = vperm.xlu1 %1216, %v562_v24   ;;  %p1219_p13 = pnand %p1218_p12, %p1428_p4 }
  0x28   : > { %p1226_p3 = por %p1225_p2, %p1224_p1 }
  0x29   : > { %p1220_p0 = pneg %p1219_p13 }
  0x2a   : > { %1095 = vmatmul.mubr.msk.f32.vlgmr.msra.gmra.mrb[0].mxu0 %vm439_vm0, %v411_v22  ;;  %597 = vperm.xlu0 %1215, %v563_v26  }
  0x2b   : > { %522 = vmatprep.mubr.f32.mxu0 %v1329_v0  ;;  %602 = vperm.xlu1 %1216, %v564_v27   ;;  %p1227_p5 = pnand %p1226_p3, %p1220_p0 }
  0x2e   : > { %1096 = vmatmul.mubr.msk.f32.gmra.mrb[2].mxu0 %vm439_vm0, %v412_v25  ;;  %762 = vperm.xlu0 %1215, %v759_v29  }
  0x2f   : > { %528 = vmatprep.mubr.f32.mxu0 %v1329_v0  ;;  %855 = vperm.xlu1 %1216, %v852_v30  }
  0x32   : > { %1097 = vmatmul.mubr.msk.f32.gmra.mrb[4].mxu0 %vm439_vm0, %v413_v28 }
  0x33   : > { %534 = vmatprep.mubr.f32.mxu0 %v1329_v0 }
  0x36   : > { %1098 = vmatmul.mubr.msk.f32.gmra.mrb[6].mxu0 %vm439_vm0, %v414_v31 }
  0x37   : > { %832 = vmatprep.mubr.f32.mxu0 %v1329_v0 }
  0x95   : > { %v422_v32 = vpop.permute.xlu0 %421  ;;  %v432_v41 = vpop.permute.xlu1 %431 }
  0x99   : > { %v427_v36 = vpop.permute.xlu0 %426  ;;  %v437_v52 = vpop.permute.xlu1 %436 }
  0x9d   : > { %v568_v11 = vpop.permute.xlu0 %567  ;;  %v573_v13 = vpop.permute.xlu1 %572 }
  0xa1   : > { %v578_v26 = vpop.permute.xlu0 %577 }
  0xa2   : > { %v583_v29 = vpop.permute.xlu1 %582 }
  0xfd   : > { %v518_v33 = vpop.f32.mrb[0].mxu0 }
  0xfe   : > { %v520_v34 = vpop.f32.mrb[1].mxu0  ;;  %v519_v35 = vadd.f32 %v518_v33, %v422_v32 }
  0xff   : > { %v521_v37 = vadd.f32 %v520_v34, %v422_v32 }
 0x100   : > { %v541_v43 = vmax.f32 %v519_v35, 0.0 }
 0x101   : > { %v524_v38 = vpop.f32.mrb[2].mxu0  ;;  %v542_v45 = vmax.f32 %v521_v37, 0.0 }
 0x102   : > { %v525_v39 = vadd.f32 %v524_v38, %v427_v36  ;;  %v526_v40 = vpop.f32.mrb[3].mxu0 }
 0x103   : > { %v527_v42 = vadd.f32 %v526_v40, %v427_v36 }
 0x104   : > { %v543_v44 = vmax.f32 %v525_v39, 0.0 }
 0x105   : > { %v544_v46 = vmax.f32 %v527_v42, 0.0  ;;  %v530_v47 = vpop.f32.mrb[4].mxu0  ;;  %v588_v42 = vpop.permute.xlu0 %587 }
 0x106   : > { %v532_v48 = vpop.f32.mrb[5].mxu0  ;;  %v1131_v49 = vpack.c.bf16 %v543_v44, %v541_v43  ;;  %v531_v51 = vadd.f32 %v530_v47, %v432_v41 }
 0x107   : > { %v1129_v50 = vpack.c.bf16 %v544_v46, %v542_v45  ;;  %v533_v53 = vadd.f32 %v532_v48, %v432_v41  ;;  %v593_v45 = vpop.permute.xlu1 %592 }
 0x108   : > { %v545_v58 = vmax.f32 %v531_v51, 0.0 }
 0x109   : > { %v536_v54 = vpop.f32.mrb[6].mxu0  ;;  %1130 = vmatprep.subr.bf16.mxu1 %v1129_v50  ;;  %v546_v60 = vmax.f32 %v533_v53, 0.0  ;;  %v758_v50 = vld [vmem:[%s1652_s5] sm:$0x3] }
 0x10a   : > { %v537_v55 = vadd.f32 %v536_v54, %v437_v52  ;;  %v538_v56 = vpop.f32.mrb[7].mxu0  ;;  %1132 = vmatpush1.bf16.msra.mxu1 %v1131_v49 }
 0x10b   : > { %v539_v57 = vadd.f32 %v538_v56, %v437_v52 }
 0x10c   : > { %v547_v59 = vmax.f32 %v537_v55, 0.0 }
 0x10d   : > { %v548_v61 = vmax.f32 %v539_v57, 0.0 }
 0x10e   : > { %v1135_v62 = vpack.c.bf16 %v547_v59, %v545_v58  ;;  %v598_v59 = vpop.permute.xlu0 %597 }
 0x10f   : > { %v1133_v63 = vpack.c.bf16 %v548_v61, %v546_v60 }
 0x111   : > { %1134 = vmatprep.subr.bf16.mxu1 %v1133_v63 }
 0x112   : > { %1136 = vmatpush1.bf16.msra.mxu1 %v1135_v62  ;;  %v603_v62 = vpop.permute.xlu1 %602 }
 0x115   : > { %1099 = vmatmul.mubr.msk.f32.vlgmr.msra.gmra.mrb[0].mxu1 %vm439_vm0, %v549_v1 }
 0x116   : > { %699 = vmatprep.mubr.f32.mxu1 %v1329_v0 }
 0x119   : > { %1100 = vmatmul.mubr.msk.f32.gmra.mrb[2].mxu1 %vm439_vm0, %v550_v2 }
 0x11a   : > { %705 = vmatprep.mubr.f32.mxu1 %v1329_v0 }
 0x11d   : > { %1101 = vmatmul.mubr.msk.f32.gmra.mrb[4].mxu1 %vm439_vm0, %v551_v3 }
 0x11e   : > { %711 = vmatprep.mubr.f32.mxu1 %v1329_v0 }
 0x121   : > { %1102 = vmatmul.mubr.msk.f32.gmra.mrb[6].mxu1 %vm439_vm0, %v552_v4 }
 0x122   : > { %717 = vmatprep.mubr.f32.mxu1 %v1329_v0 }
 0x125   : > { %1103 = vmatmul.mubr.msk.f32.gmra.mrb[8].mxu1 %vm439_vm0, %v553_v5 }
 0x126   : > { %723 = vmatprep.mubr.f32.mxu1 %v1329_v0 }
 0x129   : > { %1104 = vmatmul.mubr.msk.f32.gmra.mrb[10].mxu1 %vm439_vm0, %v554_v6 }
 0x12a   : > { %729 = vmatprep.mubr.f32.mxu1 %v1329_v0 }
 0x12d   : > { %1105 = vmatmul.mubr.msk.f32.gmra.mrb[12].mxu1 %vm439_vm0, %v555_v7 }
 0x12e   : > { %735 = vmatprep.mubr.f32.mxu1 %v1329_v0 }
 0x131   : > { %1106 = vmatmul.mubr.msk.f32.gmra.mrb[14].mxu1 %vm439_vm0, %v556_v8 }
 0x1e8   : > { %v695_v9 = vpop.f32.mrb[0].mxu1 }
 0x1e9   : > { %v697_v10 = vpop.f32.mrb[1].mxu1  ;;  %v696_v12 = vadd.f32 %v695_v9, %v568_v11 }
 0x1ea   : > { %v698_v14 = vadd.f32 %v697_v10, %v568_v11  ;;  %v763_v11 = vpop.permute.xlu0 %762 }
 0x1eb   : > { %v742_v19 = vmax.f32 %v696_v12, 0.0 }
 0x1ec   : > { %v701_v15 = vpop.f32.mrb[2].mxu1  ;;  %v743_v21 = vmax.f32 %v698_v14, 0.0 }
 0x1ed   : > { %v702_v16 = vadd.f32 %v701_v15, %v573_v13  ;;  %v703_v17 = vpop.f32.mrb[3].mxu1 }
 0x1ee   : > { %v704_v18 = vadd.f32 %v703_v17, %v573_v13 }
 0x1ef   : > { %v744_v20 = vmax.f32 %v702_v16, 0.0 }
 0x1f0   : > { %v745_v22 = vmax.f32 %v704_v18, 0.0  ;;  %v707_v23 = vpop.f32.mrb[4].mxu1 }
 0x1f1   : > { %v1139_v24 = vpack.c.bf16 %v744_v20, %v742_v19  ;;  %v709_v25 = vpop.f32.mrb[5].mxu1  ;;  %v708_v28 = vadd.f32 %v707_v23, %v578_v26 }
 0x1f2   : > { %v1137_v27 = vpack.c.bf16 %v745_v22, %v743_v21  ;;  %v710_v30 = vadd.f32 %v709_v25, %v578_v26 }
 0x1f3   : > { %v746_v35 = vmax.f32 %v708_v28, 0.0 }
 0x1f4   : > { %v713_v31 = vpop.f32.mrb[6].mxu1  ;;  %1138 = vmatprep.subr.bf16.mxu0 %v1137_v27  ;;  %v747_v37 = vmax.f32 %v710_v30, 0.0 }
 0x1f5   : > { %v714_v32 = vadd.f32 %v713_v31, %v583_v29  ;;  %v715_v33 = vpop.f32.mrb[7].mxu1  ;;  %1140 = vmatpush1.bf16.msra.mxu0 %v1139_v24 }
 0x1f6   : > { %v716_v34 = vadd.f32 %v715_v33, %v583_v29 }
 0x1f7   : > { %v748_v36 = vmax.f32 %v714_v32, 0.0 }
 0x1f8   : > { %v749_v38 = vmax.f32 %v716_v34, 0.0  ;;  %v719_v39 = vpop.f32.mrb[8].mxu1 }
 0x1f9   : > { %v1143_v40 = vpack.c.bf16 %v748_v36, %v746_v35  ;;  %v721_v41 = vpop.f32.mrb[9].mxu1  ;;  %v720_v44 = vadd.f32 %v719_v39, %v588_v42 }
 0x1fa   : > { %v1141_v43 = vpack.c.bf16 %v749_v38, %v747_v37  ;;  %v722_v46 = vadd.f32 %v721_v41, %v588_v42 }
 0x1fb   : > { %v750_v52 = vmax.f32 %v720_v44, 0.0 }
 0x1fc   : > { %v725_v47 = vpop.f32.mrb[10].mxu1  ;;  %1142 = vmatprep.subr.bf16.mxu0 %v1141_v43  ;;  %v751_v54 = vmax.f32 %v722_v46, 0.0 }
 0x1fd   : > { %v726_v48 = vadd.f32 %v725_v47, %v593_v45  ;;  %v727_v49 = vpop.f32.mrb[11].mxu1  ;;  %1144 = vmatpush1.bf16.msra.mxu0 %v1143_v40 }
 0x1fe   : > { %v728_v51 = vadd.f32 %v727_v49, %v593_v45 }
 0x1ff   : > { %v752_v53 = vmax.f32 %v726_v48, 0.0 }
 0x200   : > { %v753_v55 = vmax.f32 %v728_v51, 0.0  ;;  %v731_v56 = vpop.f32.mrb[12].mxu1  ;;  %1107 = vmatmul.mubr.msk.f32.vlgmr.msra.gmra.mrb[8].mxu0 %vm439_vm0, %v758_v50 }
 0x201   : > { %v1147_v57 = vpack.c.bf16 %v752_v53, %v750_v52  ;;  %v733_v58 = vpop.f32.mrb[13].mxu1  ;;  %925 = vmatprep.mubr.f32.mxu0 %v1329_v0  ;;  %v732_v61 = vadd.f32 %v731_v56, %v598_v59  ;;  %v851_v0 = vld [vmem:[%s1654_s7] sm:$0xf] }
 0x202   : > { %v1145_v60 = vpack.c.bf16 %v753_v55, %v751_v54  ;;  %v734_v63 = vadd.f32 %v733_v58, %v598_v59 }
 0x203   : > { %v754_v5 = vmax.f32 %v732_v61, 0.0 }
 0x204   : > { %v737_v1 = vpop.f32.mrb[14].mxu1  ;;  %1146 = vmatprep.subr.bf16.mxu0 %v1145_v60  ;;  %v755_v7 = vmax.f32 %v734_v63, 0.0 }
 0x205   : > { %v738_v2 = vadd.f32 %v737_v1, %v603_v62  ;;  %v739_v3 = vpop.f32.mrb[15].mxu1  ;;  %1148 = vmatpush1.bf16.msra.mxu0 %v1147_v57 }
 0x206   : > { %v740_v4 = vadd.f32 %v739_v3, %v603_v62 }
 0x207   : > { %v756_v6 = vmax.f32 %v738_v2, 0.0 }
 0x208   : > { %v757_v8 = vmax.f32 %v740_v4, 0.0 }
 0x209   : > { %v1151_v9 = vpack.c.bf16 %v756_v6, %v754_v5 }
 0x20a   : > { %v1149_v10 = vpack.c.bf16 %v757_v8, %v755_v7 }
 0x20c   : > { %1150 = vmatprep.subr.bf16.mxu0 %v1149_v10 }
 0x20d   : > { %1152 = vmatpush1.bf16.msra.mxu0 %v1151_v9 }
 0x210   : > { %1109 = vmatmul.mubr.msk.f32.vlgmr.msra.gmra.mrb[10].mxu0 %vm439_vm0, %v851_v0 }
 0x2d3   : > { %v834_v12 = vpop.f32.mrb[8].mxu0 }
 0x2d4   : > { %v835_v13 = vadd.f32 %v834_v12, %v763_v11  ;;  %v836_v14 = vpop.f32.mrb[9].mxu0 }
 0x2d5   : > { %v837_v15 = vadd.f32 %v836_v14, %v763_v11 }
 0x2d7   : > { %v841_v16 = vcombine.low %v835_v13, %v837_v15 }
 0x2d9   : > { %1108 = vst.sshfl [vmem:[%s383_s11] sm:$0x33 pattern:$0x76325410] %v841_v16 }
 0x2da   : > { %1230 = shalt.err (!%p1227_p5)
}
 0x2db   : > { %s1231_s30 = scalar_lea.hbm %s1568_s22, 64  ;;  %s1235_s20 = scalar_lea.hbm %s1656_s9, 128 }
 0x2dc   : > { %p1232_p6 = scmp.ne.s32.totalorder %s1568_s22, %s1231_s30  ;;  %p1236_p10 = scmp.lt.u32.totalorder %s1568_s22, %s1656_s9 }
 0x2dd   : > { %p1237_p11 = scmp.lt.u32.totalorder %s1235_s20, %s1231_s30  ;;  %p1239_p13 = scmp.lt.u32.totalorder %s1231_s30, %s1568_s22 }
 0x2de   : > { %p1233_p7 = pnand %p1232_p6, %p1428_p4 }
 0x2df   : > { %p1238_p12 = por %p1237_p11, %p1236_p10 }
 0x2e0   : > { %p1234_p9 = pneg %p1233_p7 }
 0x2e1   : > { %p1240_p0 = por %p1239_p13, %p1238_p12 }
 0x2e3   : > { %p1241_p1 = pnand %p1240_p0, %p1234_p9 }
 0x2e5   : > { %1244 = shalt.err (!%p1241_p1)
}
 0x2e6   : > { %1153 = dma.vmem_to_hbm [thread:$0]  (%p1428_p4), %s1570_s19, 64, %s1568_s22, %s938_s24   ;;  %v856_v17 = vpop.permute.xlu1 %855  ;;  %v927_v18 = vpop.f32.mrb[10].mxu0 }
 0x2e7   : > { %s1092_s1 = sshll.u32 %s1561_s28, 3  ;;  %v928_v19 = vadd.f32 %v927_v18, %v856_v17  ;;  %v929_v20 = vpop.f32.mrb[11].mxu0  ;;  %s1120_s27 = sshll.u32 %s1319_s16, 7 }
 0x2e8   : > { %s390_s11 = scalar_lea.vmem [#allocation4], %s1092_s1  ;;  %v930_v21 = vadd.f32 %v929_v20, %v856_v17  ;;  %s1599_s29 = scalar_lea.hbm %s1657_s10, %s1120_s27 }
 0x2e9   : > { %s975_s30 = sshll.u32 %s390_s11, 4  ;;  %s943_s19 = scalar_lea.sflag [#allocation5], %s1561_s28  ;;  %s1601_s30 = int_to_ptr.vmem [resolvable:$true] %s975_s30 }
 0x2ea   : > { %v934_v22 = vcombine.low %v928_v19, %v930_v21  ;;  %s1245_s22 = scalar_lea.vmem %s1601_s30, 128  ;;  %s1332_s16 = smov [#allocation4]  }
 0x2eb   : > { %p1246_p2 = scmp.ne.s32.totalorder %s1601_s30, %s1245_s22  ;;  %s1249_s24 = sshll.u32 %s1332_s16, 4  ;;  %s1250_s24 = int_to_ptr.vmem [resolvable:$false] %s1249_s24 }
 0x2ec   : > { %936 = vst [vmem:[%s390_s11] sm:$0xff] %v934_v22  ;;  %s1251_s0 = scalar_lea.vmem %s1250_s24, 256  ;;  %p1252_p6 = scmp.lt.s32.totalorder %s1601_s30, %s1250_s24 }
 0x2ed   : > { %p1247_p3 = pnand %p1246_p2, %p1428_p4  ;;  %p1253_p7 = scmp.lt.s32.totalorder %s1251_s0, %s1245_s22 }
 0x2ef   : > { %p1248_p5 = pneg %p1247_p3  ;;  %p1254_p9 = por %p1253_p7, %p1252_p6 }
 0x2f1   : > { %p1255_p10 = pnand %p1254_p9, %p1248_p5 }
 0x2f3   : > { %1258 = shalt.err (!%p1255_p10)
}
 0x2f4   : > { %s1259_s28 = scalar_lea.hbm %s1599_s29, 128  ;;  %s1263_s11 = scalar_lea.hbm %s1657_s10, 256 }
 0x2f5   : > { %p1260_p11 = scmp.ne.s32.totalorder %s1599_s29, %s1259_s28  ;;  %p1264_p0 = scmp.lt.u32.totalorder %s1599_s29, %s1657_s10 }
 0x2f6   : > { %p1265_p1 = scmp.lt.u32.totalorder %s1263_s11, %s1259_s28  ;;  %p1267_p3 = scmp.lt.u32.totalorder %s1259_s28, %s1599_s29 }
 0x2f7   : > { %p1261_p12 = pnand %p1260_p11, %p1428_p4 }
 0x2f8   : > { %p1266_p2 = por %p1265_p1, %p1264_p0 }
 0x2f9   : > { %p1262_p13 = pneg %p1261_p12 }
 0x2fa   : > { %p1268_p5 = por %p1267_p3, %p1266_p2 }
 0x2fc   : > { %p1269_p6 = pnand %p1268_p5, %p1262_p13 }
 0x2fe   : > { %1272 = shalt.err (!%p1269_p6)
}
 0x2ff   : > { %1154 = dma.vmem_to_hbm [thread:$0]  (%p1428_p4), %s1601_s30, 128, %s1599_s29, %s943_s19  }
 0x300 PF: > { %p1164_p7 = scmp.ge.s32.totalorder %s1327_s18, 2  ;;  %s987_s22 = sand.u32 1, %s1307_s13  }
 0x301   : > { %s988_s16 = scalar_lea.sflag [#allocation3], %s987_s22 }
 0x302   : > { %p1158_p9 = pnand %p1164_p7, %p1435_p8 }
 0x304   : > { %1298 = dma.done.wait (!%p1158_p9), %s988_s16, 64  }
 0x305   : > { %1300 = vsyncadd (!%p1158_p9), %s988_s16, 4294967232  ;;  %s997_s24 = scalar_lea.sflag [#allocation5], %s987_s22 }
 0x306   : > { %1302 = dma.done.wait (!%p1158_p9), %s997_s24, 128  }
 0x307   : > { %1304 = vsyncadd (!%p1158_p9), %s997_s24, 4294967168  ;;  %s27_s18 = sadd.s32 1, %s1327_s18   ;;  %s1664_s13 = smov %s1311_s14 }
 0x308   : > { %p24_p10 = scmp.ge.s32.totalorder %s27_s18, 4   ;;  %s1665_s14 = smov %s1315_s15 }
 0x309   : > { %s1666_s15 = smov %s1441_s26  ;;  %s1667_s16 = smov %s1323_s17 }
 0x30a   : > { %s1668_s17 = smov %s1670_s21  ;;  %26 = sbr.rel (!%p24_p10) target bundleno = 9 (0x9), region = 108 }
 0x311   :  { %1002 = vsyncpa [#allocation3], 1 }
 0x312   :  { %1004 = vsyncpa [#allocation3 + $0x1], 1 }
 0x313   :  { %1005 = vsyncpa [#allocation5], 1 }
 0x314   :  { %1007 = vsyncpa [#allocation5 + $0x1], 1 }

</bundles_post_ra>
